<compile_context>
chip_gen: v6e
topology: v6e:2x2x1
jax: 0.10.0
libtpu: 0.0.40
codegen_flags: <defaults>
</compile_context>

<pallas_src>
import functools

import jax
import jax.numpy as jnp
from jax.experimental import pallas as pl
from jax.experimental.pallas import tpu as pltpu

LANE = 128
_MAX_TILE_R = 8192      # rows; 8192*128*4B = 4 MiB per f32 (r,128) slab
_FOLD_T_MAX = 32        # code-size cap on folding the time axis into the block
_ROW_CHUNK = 64         # rows per in-vreg membrane carry in the fused kernel


# --------------------------------------------------------------------------
# hardware-aware sizing helpers
# --------------------------------------------------------------------------
def _vmem_budget():
    """(per-grid-step block budget, scoped-VMEM limit), sized from hardware."""
    try:
        cap = int(pltpu.get_tpu_info().vmem_capacity_bytes)
    except Exception:
        cap = 64 * 1024 * 1024                     # conservative (v7x) fallback
    block_budget = max(8 << 20, (cap * 3) // 8)    # 24 MiB @64 MiB, 48 MiB @128 MiB
    vmem_limit = max(block_budget + (16 << 20), (cap * 5) // 8)   # 40 / 80 MiB
    return block_budget, vmem_limit


def _choose_tile_r(r_total, cap_rows):
    """Big row tiles, multiple of 8 (64 when large), even tile count (v7x)."""
    if r_total <= 8:
        return r_total                              # single tiny full-extent block
    cap = max(8, min(cap_rows, _MAX_TILE_R))
    n_tiles = max(2, pl.cdiv(r_total, cap))
    if n_tiles % 2:
        n_tiles += 1                                # even -> balanced megacore split
    tile_r = pl.cdiv(r_total, n_tiles)
    align = _ROW_CHUNK if tile_r >= _ROW_CHUNK else 8
    return pl.cdiv(tile_r, align) * align


def _choose_chunk(tile_r):
    for c in (_ROW_CHUNK, 32, 16, 8):
        if tile_r % c == 0:
            return c
    return tile_r


# --------------------------------------------------------------------------
# kernels
# --------------------------------------------------------------------------
def _lif_fused_kernel(x_ref, o_ref, *, T, chunk, n_chunks, tau, thresh,
                      input_decay):
    """Block = (T, tile_r, 128). The T recurrence runs per row chunk so the
    membrane carry stays in vregs instead of spilling to VMEM each timestep."""

    def run_rows(r0):
        mem = jnp.zeros((chunk, LANE), jnp.float32)
        for t in range(T):                           # unrolled: T is static/small
            x = x_ref[t, pl.ds(r0, chunk), :].astype(jnp.float32)
            if input_decay:
                mem = (mem + x) * tau if tau != 1.0 else mem + x
            else:
                mem = mem * tau + x if tau != 1.0 else mem + x
            cond = mem >= thresh
            o_ref[t, pl.ds(r0, chunk), :] = cond.astype(o_ref.dtype)
            mem = jnp.where(cond, 0.0, mem)

    if n_chunks == 1:
        run_rows(0)
    else:
        @pl.loop(0, n_chunks)
        def _(c):
            run_rows(pl.multiple_of(c * chunk, chunk))


def _lif_stepped_kernel(x_ref, o_ref, mem_ref, *, tau, thresh, input_decay):
    """Block = (1, tile_r, 128); t is the inner ('arbitrary') grid axis and the
    membrane potential lives in VMEM scratch across timesteps."""
    t = pl.program_id(1)

    @pl.when(t == 0)
    def _():
        mem_ref[...] = jnp.zeros_like(mem_ref)

    x = x_ref[0].astype(jnp.float32)
    mem = mem_ref[...]
    if input_decay:
        mem = (mem + x) * tau if tau != 1.0 else mem + x
    else:
        mem = mem * tau + x if tau != 1.0 else mem + x
    cond = mem >= thresh
    o_ref[0] = cond.astype(o_ref.dtype)
    mem_ref[...] = jnp.where(cond, 0.0, mem)


# --------------------------------------------------------------------------
# wrapper
# --------------------------------------------------------------------------
def lif_forward(x, T, *, thresh=1.0, tau=1.0, input_decay=False):
    """x: (T*B, C, H, W), any float dtype -> binary spikes, same shape/dtype."""
    orig_shape = x.shape
    assert orig_shape[0] % T == 0, "leading dim must be divisible by T"
    if not jnp.issubdtype(x.dtype, jnp.floating):
        x = x.astype(jnp.float32)
    dtype = x.dtype

    n_per_t = 1
    for d in orig_shape:
        n_per_t *= int(d)
    n_per_t //= T

    x2 = x.reshape(T, n_per_t)
    n_pad = (-n_per_t) % LANE
    if n_pad:
        # TODO(synk): lane-unaligned feature counts pay one extra HBM pass for
        # pad + trim; a ragged 2-D layout would avoid it at the cost of sublane
        # under-utilisation inside the kernel.
        x2 = jnp.pad(x2, ((0, 0), (0, n_pad)))
    n_tot = n_per_t + n_pad
    r_total = n_tot // LANE
    x3 = x2.reshape(T, r_total, LANE)

    itemsize = jnp.dtype(dtype).itemsize
    block_budget, vmem_limit = _vmem_budget()

    # Fold the time axis into the block when 2x in + 2x out double buffers of a
    # (T, >=512-row, 128) block still fit the budget (and unrolled code stays
    # reasonable); otherwise step the grid over T with a VMEM-resident membrane.
    fold_rows = min(512, max(8, r_total))
    fold_t = (T <= _FOLD_T_MAX
              and 4 * T * fold_rows * LANE * itemsize <= block_budget)

    if fold_t:
        cap_rows = block_budget // (4 * T * LANE * itemsize)
    else:
        cap_rows = block_budget // (4 * LANE * itemsize + LANE * 4)
    tile_r = _choose_tile_r(r_total, max(8, cap_rows))
    n_row_tiles = pl.cdiv(r_total, tile_r)

    if fold_t:
        chunk = _choose_chunk(tile_r)
        kernel = functools.partial(
            _lif_fused_kernel, T=T, chunk=chunk, n_chunks=tile_r // chunk,
            tau=float(tau), thresh=float(thresh), input_decay=bool(input_decay))
        out3 = pl.pallas_call(
            kernel,
            out_shape=jax.ShapeDtypeStruct((T, r_total, LANE), dtype),
            grid_spec=pltpu.PrefetchScalarGridSpec(
                num_scalar_prefetch=0,
                grid=(n_row_tiles,),
                in_specs=[pl.BlockSpec((T, tile_r, LANE), lambda r: (0, r, 0))],
                out_specs=pl.BlockSpec((T, tile_r, LANE), lambda r: (0, r, 0)),
            ),
            compiler_params=pltpu.CompilerParams(
                dimension_semantics=("parallel",),
                vmem_limit_bytes=vmem_limit),
        )(x3)
    else:
        kernel = functools.partial(
            _lif_stepped_kernel, tau=float(tau), thresh=float(thresh),
            input_decay=bool(input_decay))
        out3 = pl.pallas_call(
            kernel,
            out_shape=jax.ShapeDtypeStruct((T, r_total, LANE), dtype),
            grid_spec=pltpu.PrefetchScalarGridSpec(
                num_scalar_prefetch=0,
                grid=(n_row_tiles, T),
                in_specs=[pl.BlockSpec((1, tile_r, LANE), lambda r, t: (t, r, 0))],
                out_specs=pl.BlockSpec((1, tile_r, LANE), lambda r, t: (t, r, 0)),
                scratch_shapes=[pltpu.VMEM((tile_r, LANE), jnp.float32)],
            ),
            compiler_params=pltpu.CompilerParams(
                dimension_semantics=("parallel", "arbitrary"),
                vmem_limit_bytes=vmem_limit),
        )(x3)

    # TODO(synk): if downstream tolerates int8 spikes, set the out_shape dtype
    # to int8 above to cut HBM write traffic further (kernel is bandwidth-bound).
    out2 = out3.reshape(T, n_tot)
    if n_pad:
        out2 = out2[:, :n_per_t]
    return out2.reshape(orig_shape)


# --------------------------------------------------------------------------
# pure-JAX reference (mirrors the PyTorch bptt loop)
# --------------------------------------------------------------------------
def lif_reference(x, T, *, thresh=1.0, tau=1.0, input_decay=False):
    shp = x.shape
    xt = x.reshape((T, shp[0] // T) + shp[1:]).astype(jnp.float32)
    mem = jnp.zeros_like(xt[0])
    spikes = []
    for t in range(T):
        mem = (mem + xt[t]) * tau if input_decay else mem * tau + xt[t]
        spike = (mem - thresh >= 0.0).astype(jnp.float32)
        mem = (1.0 - spike) * mem
        spikes.append(spike)
    return jnp.stack(spikes, axis=0).reshape(shp).astype(x.dtype)


if __name__ == "__main__":
    key = jax.random.PRNGKey(0)
    k1, k2, k3, k4 = jax.random.split(key, 4)

    # 1) main case: T=4, (B,C,H,W)=(2,4,16,16) -> lane-aligned, fused path
    T = 4
    x1 = jax.random.normal(k1, (T * 2, 4, 16, 16), dtype=jnp.float32) * 1.5
    out1 = jax.block_until_ready(lif_forward(x1, T, thresh=1.0, tau=1.0))
    ref1 = lif_reference(x1, T, thresh=1.0, tau=1.0)
    assert out1.shape == x1.shape and out1.dtype == x1.dtype
    assert float(jnp.max(jnp.abs(out1 - ref1))) < 1e-5

    # 2) leaky + input_decay, lane-unaligned features (pad/trim + partial block)
    x2 = jax.random.normal(k2, (T * 2, 3, 15, 15), dtype=jnp.float32) * 1.5
    out2 = jax.block_until_ready(
        lif_forward(x2, T, thresh=1.0, tau=0.9, input_decay=True))
    ref2 = lif_reference(x2, T, thresh=1.0, tau=0.9, input_decay=True)
    assert float(jnp.max(jnp.abs(out2 - ref2))) < 1e-5

    # 3) large T -> stepped path (2-D grid, VMEM membrane scratch)
    T3 = 40
    x3 = jax.random.normal(k3, (T3 * 2, 4, 16, 16), dtype=jnp.float32) * 1.5
    out3 = jax.block_until_ready(lif_forward(x3, T3, thresh=1.0, tau=1.0))
    ref3 = lif_reference(x3, T3, thresh=1.0, tau=1.0)
    assert float(jnp.max(jnp.abs(out3 - ref3))) < 1e-5

    # 4) bf16 input: DMA'd as bf16, recurrence in f32, spikes stored as bf16
    x4 = (jax.random.normal(k4, (T * 2, 4, 16, 16), dtype=jnp.float32)
          * 1.5).astype(jnp.bfloat16)
    out4 = jax.block_until_ready(lif_forward(x4, T, thresh=1.0, tau=1.0))
    ref4 = lif_reference(x4, T, thresh=1.0, tau=1.0)
    assert out4.dtype == jnp.bfloat16
    assert float(jnp.max(jnp.abs(out4.astype(jnp.float32)
                                 - ref4.astype(jnp.float32)))) < 1e-5

    print("KERNEL_OK")
</pallas_src>

<mosaic_0001>
module attributes {stable_mosaic.version = 11 : i64} {
  func.func @_lif_fused_kernel(%arg0: i32, %arg1: memref<4x8x128xf32, #tpu.memory_space<vmem>>, %arg2: memref<4x8x128xf32, #tpu.memory_space<vmem>>) attributes {dimension_semantics = [#tpu.dimension_semantics<parallel>], iteration_bounds = array<i64: 2>, scalar_prefetch = 0 : i64, scratch_operands = 0 : i64, tpu.core_type = #tpu.core_type<tc>, window_params = [{transform_indices = @transform_0, window_bounds = array<i64: 4, 8, 128>}, {transform_indices = @transform_1, window_bounds = array<i64: 4, 8, 128>}]} {
    %cst = arith.constant 0.000000e+00 : f32
    %0 = vector.broadcast %cst : f32 to vector<8x128xf32>
    %c0 = arith.constant 0 : index
    %c0_0 = arith.constant 0 : index
    %c0_1 = arith.constant 0 : index
    %1 = vector.load %arg1[%c0, %c0_0, %c0_1] : memref<4x8x128xf32, #tpu.memory_space<vmem>>, vector<1x8x128xf32>
    %2 = vector.shape_cast %1 : vector<1x8x128xf32> to vector<8x128xf32>
    %3 = arith.addf %0, %2 : vector<8x128xf32>
    %cst_2 = arith.constant 1.000000e+00 : f32
    %4 = vector.broadcast %cst_2 : f32 to vector<8x128xf32>
    %5 = arith.cmpf oge, %3, %4 : vector<8x128xf32>
    %6 = arith.extui %5 : vector<8x128xi1> to vector<8x128xi32>
    %7 = arith.sitofp %6 : vector<8x128xi32> to vector<8x128xf32>
    %c0_3 = arith.constant 0 : index
    %c0_4 = arith.constant 0 : index
    %c0_5 = arith.constant 0 : index
    %8 = vector.load %arg2[%c0_3, %c0_4, %c0_5] : memref<4x8x128xf32, #tpu.memory_space<vmem>>, vector<1x8x128xf32>
    %9 = vector.shape_cast %8 : vector<1x8x128xf32> to vector<8x128xf32>
    %10 = vector.shape_cast %7 : vector<8x128xf32> to vector<1x8x128xf32>
    tpu.vector_store %arg2[%c0_3, %c0_4, %c0_5], %10 {strides = array<i32>} : memref<4x8x128xf32, #tpu.memory_space<vmem>>, vector<1x8x128xf32>,
    %cst_6 = arith.constant 0.000000e+00 : f32
    %11 = vector.broadcast %cst_6 : f32 to vector<8x128xf32>
    %12 = arith.select %5, %11, %3 : vector<8x128xi1>, vector<8x128xf32>
    %c1 = arith.constant 1 : index
    %c0_7 = arith.constant 0 : index
    %c0_8 = arith.constant 0 : index
    %13 = vector.load %arg1[%c1, %c0_7, %c0_8] : memref<4x8x128xf32, #tpu.memory_space<vmem>>, vector<1x8x128xf32>
    %14 = vector.shape_cast %13 : vector<1x8x128xf32> to vector<8x128xf32>
    %15 = arith.addf %12, %14 : vector<8x128xf32>
    %cst_9 = arith.constant 1.000000e+00 : f32
    %16 = vector.broadcast %cst_9 : f32 to vector<8x128xf32>
    %17 = arith.cmpf oge, %15, %16 : vector<8x128xf32>
    %18 = arith.extui %17 : vector<8x128xi1> to vector<8x128xi32>
    %19 = arith.sitofp %18 : vector<8x128xi32> to vector<8x128xf32>
    %c1_10 = arith.constant 1 : index
    %c0_11 = arith.constant 0 : index
    %c0_12 = arith.constant 0 : index
    %20 = vector.load %arg2[%c1_10, %c0_11, %c0_12] : memref<4x8x128xf32, #tpu.memory_space<vmem>>, vector<1x8x128xf32>
    %21 = vector.shape_cast %20 : vector<1x8x128xf32> to vector<8x128xf32>
    %22 = vector.shape_cast %19 : vector<8x128xf32> to vector<1x8x128xf32>
    tpu.vector_store %arg2[%c1_10, %c0_11, %c0_12], %22 {strides = array<i32>} : memref<4x8x128xf32, #tpu.memory_space<vmem>>, vector<1x8x128xf32>,
    %cst_13 = arith.constant 0.000000e+00 : f32
    %23 = vector.broadcast %cst_13 : f32 to vector<8x128xf32>
    %24 = arith.select %17, %23, %15 : vector<8x128xi1>, vector<8x128xf32>
    %c2 = arith.constant 2 : index
    %c0_14 = arith.constant 0 : index
    %c0_15 = arith.constant 0 : index
    %25 = vector.load %arg1[%c2, %c0_14, %c0_15] : memref<4x8x128xf32, #tpu.memory_space<vmem>>, vector<1x8x128xf32>
    %26 = vector.shape_cast %25 : vector<1x8x128xf32> to vector<8x128xf32>
    %27 = arith.addf %24, %26 : vector<8x128xf32>
    %cst_16 = arith.constant 1.000000e+00 : f32
    %28 = vector.broadcast %cst_16 : f32 to vector<8x128xf32>
    %29 = arith.cmpf oge, %27, %28 : vector<8x128xf32>
    %30 = arith.extui %29 : vector<8x128xi1> to vector<8x128xi32>
    %31 = arith.sitofp %30 : vector<8x128xi32> to vector<8x128xf32>
    %c2_17 = arith.constant 2 : index
    %c0_18 = arith.constant 0 : index
    %c0_19 = arith.constant 0 : index
    %32 = vector.load %arg2[%c2_17, %c0_18, %c0_19] : memref<4x8x128xf32, #tpu.memory_space<vmem>>, vector<1x8x128xf32>
    %33 = vector.shape_cast %32 : vector<1x8x128xf32> to vector<8x128xf32>
    %34 = vector.shape_cast %31 : vector<8x128xf32> to vector<1x8x128xf32>
    tpu.vector_store %arg2[%c2_17, %c0_18, %c0_19], %34 {strides = array<i32>} : memref<4x8x128xf32, #tpu.memory_space<vmem>>, vector<1x8x128xf32>,
    %cst_20 = arith.constant 0.000000e+00 : f32
    %35 = vector.broadcast %cst_20 : f32 to vector<8x128xf32>
    %36 = arith.select %29, %35, %27 : vector<8x128xi1>, vector<8x128xf32>
    %c3 = arith.constant 3 : index
    %c0_21 = arith.constant 0 : index
    %c0_22 = arith.constant 0 : index
    %37 = vector.load %arg1[%c3, %c0_21, %c0_22] : memref<4x8x128xf32, #tpu.memory_space<vmem>>, vector<1x8x128xf32>
    %38 = vector.shape_cast %37 : vector<1x8x128xf32> to vector<8x128xf32>
    %39 = arith.addf %36, %38 : vector<8x128xf32>
    %cst_23 = arith.constant 1.000000e+00 : f32
    %40 = vector.broadcast %cst_23 : f32 to vector<8x128xf32>
    %41 = arith.cmpf oge, %39, %40 : vector<8x128xf32>
    %42 = arith.extui %41 : vector<8x128xi1> to vector<8x128xi32>
    %43 = arith.sitofp %42 : vector<8x128xi32> to vector<8x128xf32>
    %c3_24 = arith.constant 3 : index
    %c0_25 = arith.constant 0 : index
    %c0_26 = arith.constant 0 : index
    %44 = vector.load %arg2[%c3_24, %c0_25, %c0_26] : memref<4x8x128xf32, #tpu.memory_space<vmem>>, vector<1x8x128xf32>
    %45 = vector.shape_cast %44 : vector<1x8x128xf32> to vector<8x128xf32>
    %46 = vector.shape_cast %43 : vector<8x128xf32> to vector<1x8x128xf32>
    tpu.vector_store %arg2[%c3_24, %c0_25, %c0_26], %46 {strides = array<i32>} : memref<4x8x128xf32, #tpu.memory_space<vmem>>, vector<1x8x128xf32>,
    return
  }
  func.func @transform_0(%arg0: i32) -> (i32, i32, i32) {
    %c0_i32 = arith.constant 0 : i32
    %c0_i32_0 = arith.constant 0 : i32
    %c0_i32_1 = arith.constant 0 : i32
    return %c0_i32, %arg0, %c0_i32_0 : i32, i32, i32
  }
  func.func @transform_1(%arg0: i32) -> (i32, i32, i32) {
    %c0_i32 = arith.constant 0 : i32
    %c0_i32_0 = arith.constant 0 : i32
    %c0_i32_1 = arith.constant 0 : i32
    return %c0_i32, %arg0, %c0_i32_0 : i32, i32, i32
  }
}

</mosaic_0001>

<bundles_post_ra>
// kernel: tpu_custom_call.1
= control target key start
LH: loop header
LB: loop body
LE: loop exit
PB: predicated region body
PF: predicated region fallthrough
CT: control target
= control target key end

     0   :  { %6 = vsyncpa [#allocation3], 0  ;;  %s597_s0 = inlined_call_operand.hbm [shape: f32[4,16,128], index: 0, kind: input, shape index: {}]   ;;  %s598_s1 = inlined_call_operand.hbm [shape: f32[4,16,128], index: 1, kind: output, shape index: {}]  }
   0x1   :  { %8 = vsyncpa [#allocation3 + $0x1], 0 }
   0x2   :  { %9 = vsyncpa [#allocation4], 0 }
   0x3   :  { %11 = vsyncpa [#allocation4 + $0x1], 0  ;;  %s441_s6 = smov 0   ;;  %s443_s7 = smov 0  }
   0x4   :  { %s445_s8 = smov 0   ;;  %s447_s9 = smov 0  }
   0x5 LB: > { %s462_s10 = sadd.s32 4294967295, %s420_s9   ;;  %s253_s11 = sadd.s32 4294967294, %s420_s9   ;;  %s420_s9 = sphi %s447_s9, %s614_s9   ;;  %s416_s8 = sphi %s445_s8, %s613_s8   ;;  %s412_s7 = sphi %s443_s7, %s612_s7   ;;  %s408_s6 = sphi %s441_s6, %s611_s6  }
   0x6   : > { %s466_s12 = sadd.s32 1, %s420_s9   ;;  %s24_s13 = sadd.s32 1, %s416_s8 }
   0x7   : > { %s21_s14 = ssub.s32 %s420_s9, %s466_s12  ;;  %p31_p0 = scmp.ne.s32.totalorder %s416_s8, %s412_s7 }
   0x8   : > { %p22_p1 = scmp.eq.s32.totalorder %s21_s14, 0  ;;  %p32_p2 = scmp.eq.s32.totalorder %s420_s9, 0 }
   0x9   : > { %p37_p3 = scmp.ne.s32.totalorder %s412_s7, %s408_s6  ;;  %p38_p4 = scmp.eq.s32.totalorder %s462_s10, 0 }
   0xa   : > { %s478_s15 = scalar_select %p22_p1, %s416_s8, %s24_s13  }
   0xb   : > { %p480_p5 = por %p32_p2, %p31_p0  ;;  %p484_p6 = por %p38_p4, %p37_p3 }
   0xc   : > { %p61_p7 = scmp.eq.s32.totalorder %s462_s10, 1  ;;  %p67_p8 = scmp.eq.s32.totalorder %s253_s11, 1 }
   0xd   : > { %s602_s17 = scalar_select %p484_p6, 1, 0 }
   0xe   : > { %p287_p10 = scmp.lt.s32.totalorder %s420_s9, 2  ;;  %p491_p11 = por %p61_p7, %p31_p0 }
   0xf   : > { %p495_p12 = por %p67_p8, %p37_p3  ;;  %s87_s20 = sand.u32 1, %s416_s8  }
  0x10   : > { %s603_s18 = scalar_select %p491_p11, 1, 0 }
  0x11   : > { %s604_s19 = scalar_select %p495_p12, 1, 0 }
  0x12   : > { %s257_s21 = sshll.u32 %s420_s9, 7  ;;  %s256_s22 = sshll.u32 %s87_s20, 5 }
  0x13   : > { %s504_s25 = scalar_lea.hbm %s597_s0, %s257_s21  ;;  %s91_s26 = scalar_lea.vmem [#allocation2], %s256_s22 }
  0x14   : > { %s97_s27 = sshll.u32 %s91_s26, 4  ;;  %p508_p13 = pnand %p287_p10, %p480_p5  ;;  %s512_s27 = int_to_ptr.vmem [resolvable:$true] %s97_s27 }
  0x15   : > { %s515_s29 = scalar_lea.sflag [#allocation3], %s87_s20  ;;  %s328_s30 = scalar_lea.hbm %s504_s25, 512 }
  0x16   : > { %p329_p1 = scmp.ne.s32.totalorder %s504_s25, %s328_s30  ;;  %p330_p2 = pneg %p508_p13 }
  0x17   : > { %s333_s4 = scalar_lea.hbm %s597_s0, 1024  ;;  %p334_p5 = scmp.lt.s32.totalorder %s504_s25, %s597_s0 }
  0x18   : > { %p331_p3 = pnand %p330_p2, %p329_p1  ;;  %p335_p7 = scmp.lt.s32.totalorder %s333_s4, %s328_s30 }
  0x1a   : > { %p332_p4 = pneg %p331_p3  ;;  %p336_p8 = por %p335_p7, %p334_p5 }
  0x1c   : > { %p337_p10 = pnand %p336_p8, %p332_p4 }
  0x1e   : > { %340 = shalt.err (!%p337_p10)
}
  0x1f   : > { %s341_s13 = scalar_lea.vmem %s512_s27, 512  ;;  %s422_s14 = smov [#allocation2]  }
  0x20   : > { %p342_p9 = scmp.ne.s32.totalorder %s512_s27, %s341_s13  ;;  %s346_s16 = sshll.u32 %s422_s14, 4  ;;  %s347_s16 = int_to_ptr.vmem [resolvable:$false] %s346_s16 }
  0x21   : > { %s348_s20 = scalar_lea.vmem %s347_s16, 1024  ;;  %p349_p3 = scmp.lt.s32.totalorder %s512_s27, %s347_s16 }
  0x22   : > { %p344_p0 = pnand %p342_p9, %p330_p2  ;;  %p350_p12 = scmp.lt.s32.totalorder %s348_s20, %s341_s13 }
  0x24   : > { %p345_p1 = pneg %p344_p0  ;;  %p351_p11 = por %p350_p12, %p349_p3 }
  0x26   : > { %p352_p6 = pnand %p351_p11, %p345_p1 }
  0x28   : > { %355 = shalt.err (!%p352_p6)
}
  0x29   : > { %s423_s21 = smov 256   ;;  %s424_s22 = smov 128  }
  0x2a   : > { %s425_s23 = smov 8   ;;  %p105_p9 = scmp.lt.s32.totalorder %s420_s9, 3 }
  0x2b   : > { %282 = dma.hbm_to_vmem [thread:$0]  (!%p508_p13), %s504_s25, 512, %s512_s27, %s515_s29, %s423_s21, %s424_s22, %s425_s23  }
  0x2c   : > { %p606_p0 = scmp.ge.s32.totalorder %s420_s9, 1 }
  0x2e   : > { %p106_p2 = pnand %p606_p0, %p105_p9 }
  0x2f   : > { %s540_s24 = sand.u32 (!%p106_p2), 1, %s412_s7   ;;  %p607_p6 = scmp.ne.s32.totalorder (!%p106_p2), %s602_s17, 0 }
  0x30   : > { %109 = sbr.rel (%p106_p2) target bundleno = 84 (0x54), region = 24  ;;  %s259_s26 = sshll.u32 (!%p106_p2), %s540_s24, 5 }
  0x31   : > { %s112_s30 = scalar_lea.sflag (!%p106_p2), [#allocation3], %s540_s24  ;;  %s115_s2 = scalar_lea.vmem (!%p106_p2), [#allocation2], %s259_s26 }
  0x35   : > { %399 = dma.done.wait (%p607_p6), %s112_s30, 512  }
  0x36   : > { %401 = vsyncadd (%p607_p6), %s112_s30, 4294966784  ;;  %v134_v0 = vld [vmem:[%s115_s2] sm:$0xff]  ;;  %v262_v1 = vld [vmem:[%s115_s2 + $0x8] sm:$0xff]  ;;  %v426_v2 = vmov 0.0   ;;  %s133_s25 = scalar_lea.vmem [#allocation5], %s259_s26  ;;  %s272_s17 = sshll.u32 %s462_s10, 7 }
  0x37   : > { %vm136_vm0 = vcmp.ge.f32.partialorder %v134_v0, 1.0  ;;  %v265_v6 = vld [vmem:[%s115_s2 + $0x10] sm:$0xff]  ;;  %s180_s27 = sshll.u32 %s133_s25, 4  ;;  %v268_v10 = vld [vmem:[%s115_s2 + $0x18] sm:$0xff]  ;;  %s554_s3 = scalar_lea.hbm %s598_s1, %s272_s17  ;;  %s549_s27 = int_to_ptr.vmem [resolvable:$true] %s180_s27 }
  0x38   : > { %v261_v3 = vsel %vm136_vm0, 1.0, %v426_v2  ;;  %v140_v4 = vsel %vm136_vm0, 0.0, %v134_v0  ;;  %s168_s4 = scalar_lea.sflag [#allocation4], %s540_s24  ;;  %s356_s5 = scalar_lea.vmem %s549_s27, 512 }
  0x39   : > { %139 = vst [vmem:[%s133_s25] sm:$0xff] %v261_v3  ;;  %v143_v5 = vadd.f32 %v262_v1, %v140_v4  ;;  %p357_p11 = scmp.ne.s32.totalorder %s549_s27, %s356_s5  ;;  %p608_p12 = scmp.ne.s32.totalorder %s603_s18, 0 }
  0x3a   : > { %s427_s10 = smov [#allocation5]  }
  0x3b   : > { %vm144_vm1 = vcmp.ge.f32.partialorder %v143_v5, 1.0  ;;  %p358_p13 = pnand %p357_p11, %p608_p12  ;;  %s360_s11 = sshll.u32 %s427_s10, 4  ;;  %s361_s11 = int_to_ptr.vmem [resolvable:$false] %s360_s11 }
  0x3c   : > { %v263_v7 = vsel %vm144_vm1, 1.0, %v426_v2  ;;  %v149_v8 = vsel %vm144_vm1, 0.0, %v143_v5  ;;  %s362_s13 = scalar_lea.vmem %s361_s11, 1024  ;;  %p363_p5 = scmp.lt.s32.totalorder %s549_s27, %s361_s11 }
  0x3d   : > { %264 = vst [vmem:[%s133_s25 + $0x8] sm:$0xff] %v263_v7  ;;  %v152_v9 = vadd.f32 %v265_v6, %v149_v8  ;;  %p359_p4 = pneg %p358_p13  ;;  %p364_p7 = scmp.lt.s32.totalorder %s362_s13, %s356_s5 }
  0x3f   : > { %vm153_vm2 = vcmp.ge.f32.partialorder %v152_v9, 1.0  ;;  %p365_p8 = por %p364_p7, %p363_p5 }
  0x40   : > { %v266_v11 = vsel %vm153_vm2, 1.0, %v426_v2  ;;  %v158_v12 = vsel %vm153_vm2, 0.0, %v152_v9 }
  0x41   : > { %267 = vst [vmem:[%s133_s25 + $0x10] sm:$0xff] %v266_v11  ;;  %v161_v13 = vadd.f32 %v268_v10, %v158_v12  ;;  %p366_p10 = pnand %p365_p8, %p359_p4 }
  0x43   : > { %vm162_vm3 = vcmp.ge.f32.partialorder %v161_v13, 1.0 }
  0x44   : > { %v269_v14 = vsel %vm162_vm3, 1.0, %v426_v2 }
  0x45   : > { %270 = vst [vmem:[%s133_s25 + $0x18] sm:$0xff] %v269_v14 }
  0x46   : > { %369 = shalt.err (!%p366_p10)
}
  0x47   : > { %s370_s14 = scalar_lea.hbm %s554_s3, 512  ;;  %s374_s21 = scalar_lea.hbm %s598_s1, 1024 }
  0x48   : > { %p371_p1 = scmp.ne.s32.totalorder %s554_s3, %s370_s14  ;;  %p375_p0 = scmp.lt.s32.totalorder %s554_s3, %s598_s1 }
  0x49   : > { %p376_p2 = scmp.lt.s32.totalorder %s374_s21, %s370_s14 }
  0x4a   : > { %p372_p3 = pnand %p371_p1, %p608_p12 }
  0x4b   : > { %p377_p6 = por %p376_p2, %p375_p0 }
  0x4c   : > { %p373_p9 = pneg %p372_p3 }
  0x4e   : > { %p378_p11 = pnand %p377_p6, %p373_p9 }
  0x50   : > { %381 = shalt.err (!%p378_p11)
}
  0x51   : > { %s428_s26 = smov 128   ;;  %s429_s30 = smov 256  }
  0x52   : > { %s430_s2 = smov 8  }
  0x53   : > { %277 = dma.vmem_to_hbm [thread:$0]  (%p608_p12), %s549_s27, 512, %s554_s3, %s168_s4, %s428_s26, %s429_s30, %s430_s2  }
  0x54 PF: > { %s195_s25 = sand.u32 1, %s408_s6   ;;  %p609_p13 = scmp.ne.s32.totalorder %s604_s19, 0 }
  0x55   : > { %p610_p4 = scmp.ge.s32.totalorder %s420_s9, 2  ;;  %s196_s17 = scalar_lea.sflag [#allocation4], %s195_s25 }
  0x57   : > { %p284_p5 = pnand %p610_p4, %p609_p13 }
  0x59   : > { %p285_p7 = pneg %p284_p5 }
  0x5b   : > { %403 = dma.done.wait (%p285_p7), %s196_s17, 512  }
  0x5c   : > { %405 = vsyncadd (%p285_p7), %s196_s17, 4294966784  ;;  %p14_p8 = scmp.ge.s32.totalorder %s466_s12, 4   ;;  %s611_s6 = smov %s412_s7 }
  0x5d   : > { %s612_s7 = smov %s416_s8  ;;  %s613_s8 = smov %s478_s15 }
  0x5e   : > { %s614_s9 = smov %s466_s12  ;;  %16 = sbr.rel (!%p14_p8) target bundleno = 5 (0x5), region = 75 }
  0x63   :  { %201 = vsyncpa [#allocation3], 1 }
  0x64   :  { %203 = vsyncpa [#allocation3 + $0x1], 1 }
  0x65   :  { %204 = vsyncpa [#allocation4], 1 }
  0x66   :  { %206 = vsyncpa [#allocation4 + $0x1], 1 }

</bundles_post_ra>
